<compile_context>
chip_gen: v7x
topology: tpu7x:2x2x1
jax: 0.10.0
libtpu: 0.0.40
codegen_flags: <defaults>
</compile_context>

<pallas_src>
import functools

import jax
import jax.numpy as jnp
from jax import lax
from jax.experimental import pallas as pl
from jax.experimental.pallas import tpu as pltpu


def _round_up(v, m):
    return (v + m - 1) // m * m


def _cdiv(a, b):
    return (a + b - 1) // b


def _linear_kernel(x_ref, wt_ref, b_ref, o_ref, *, precision):
    # x_ref: [tb, C], wt_ref: [C, N], b_ref: [1, N] (f32), o_ref: [tb, N]
    acc = lax.dot_general(
        x_ref[...],
        wt_ref[...],
        dimension_numbers=(((1,), (0,)), ((), ())),
        preferred_element_type=jnp.float32,
        precision=precision,
    )
    o_ref[...] = (acc + b_ref[...]).astype(o_ref.dtype)


def prepare_sup_head_params(w, b, *, operand_dtype=jnp.float32):
    """One-time (init) parameter prep.

    w: [n_classes, C] (PyTorch nn.Linear layout), b: [n_classes]
    Returns wt: [C, n_classes] in `operand_dtype`, bias: [1, n_classes] f32.
    """
    wt = jnp.asarray(w).astype(operand_dtype).T
    bias = jnp.asarray(b).astype(jnp.float32).reshape(1, -1)
    return wt, bias


@functools.partial(jax.jit, static_argnames=("block_b", "precision"))
def sup_head_forward(x, wt, bias, *, block_b=512, precision=None):
    """Sup_Head forward: x @ W.T + b.

    x:    [B, C]
    wt:   [C, n_classes]  (pre-transposed weight from prepare_sup_head_params)
    bias: [1, n_classes]  (f32)
    """
    B, C = x.shape
    Cw, N = wt.shape
    assert Cw == C, (Cw, C)
    assert bias.shape == (1, N)

    out_dtype = x.dtype

    # bf16 operand path: MXU is bf16-native and this kernel is HBM-bound on
    # x and W; accumulation stays f32 via preferred_element_type + f32 bias.
    if wt.dtype == jnp.bfloat16 and x.dtype != jnp.bfloat16:
        x = x.astype(jnp.bfloat16)

    if precision is None:
        precision = (lax.Precision.HIGHEST
                     if x.dtype == jnp.float32 else lax.Precision.DEFAULT)

    # Batch tiling: a single right-sized tile for B <= block_b, otherwise the
    # most even split (avoids up-to-2x zero-row DMA for awkward batch sizes).
    # tb stays sublane-aligned (multiple of 8).
    n_tiles = _cdiv(B, block_b)
    tb = _round_up(_cdiv(B, n_tiles), 8)
    b_pad = n_tiles * tb
    if b_pad != B:
        x = jnp.pad(x, ((0, b_pad - B), (0, 0)))

    # Grid-invariant weight/bias: drop to a single pipeline buffer once the
    # weight is large enough that the (useless) second buffer would eat into
    # the scoped-VMEM budget (v5e 16 MiB default, v7x 64 MiB/TC physical).
    param_pipeline = (pl.Buffered(1)
                      if wt.size * wt.dtype.itemsize >= (1 << 20) else None)

    out = pl.pallas_call(
        functools.partial(_linear_kernel, precision=precision),
        out_shape=jax.ShapeDtypeStruct((b_pad, N), out_dtype),
        grid_spec=pltpu.PrefetchScalarGridSpec(
            num_scalar_prefetch=0,
            grid=(n_tiles,),
            in_specs=[
                pl.BlockSpec((tb, C), lambda i: (i, 0)),            # x tile
                pl.BlockSpec((C, N), lambda i: (0, 0),              # weight
                             pipeline_mode=param_pipeline),
                pl.BlockSpec((1, N), lambda i: (0, 0),              # bias
                             pipeline_mode=param_pipeline),
            ],
            out_specs=pl.BlockSpec((tb, N), lambda i: (i, 0)),
        ),
        compiler_params=pltpu.CompilerParams(
            # Independent batch tiles -> megacore / v7x dual-TC sharding.
            dimension_semantics=("parallel",),
            # Default scoped-VMEM limits are ample for resnet-head sizes
            # (<= 2048x1000 weight single-buffered); no explicit override.
        ),
    )(x, wt, bias)

    return out[:B] if b_pad != B else out


if __name__ == "__main__":
    # args.model = 'resnet18' -> n_channels = 512; args.n_classes = 10
    n_channels = 512
    n_classes = 10
    batch = 4

    key = jax.random.PRNGKey(0)
    kx, kw, kb = jax.random.split(key, 3)

    bound = 1.0 / (n_channels ** 0.5)
    x = jax.random.normal(kx, (batch, n_channels), dtype=jnp.float32)
    w = jax.random.uniform(kw, (n_classes, n_channels), minval=-bound,
                           maxval=bound, dtype=jnp.float32)
    b = jax.random.uniform(kb, (n_classes,), minval=-bound,
                           maxval=bound, dtype=jnp.float32)

    ref = x @ w.T + b

    # f32 operand path (precision=HIGHEST in-kernel -> matches f32 nn.Linear).
    wt, bias = prepare_sup_head_params(w, b)
    out = jax.block_until_ready(sup_head_forward(x, wt, bias))
    assert out.shape == (batch, n_classes)
    assert jnp.allclose(out, ref, atol=1e-3, rtol=1e-3), \
        float(jnp.max(jnp.abs(out - ref)))

    # bf16 operand path (halved HBM/VMEM traffic; f32 accumulation/bias).
    wt16, bias16 = prepare_sup_head_params(w, b, operand_dtype=jnp.bfloat16)
    out16 = jax.block_until_ready(sup_head_forward(x, wt16, bias16))
    assert out16.shape == (batch, n_classes) and out16.dtype == x.dtype
    assert jnp.allclose(out16, ref, atol=3e-2, rtol=3e-2), \
        float(jnp.max(jnp.abs(out16 - ref)))

    print("KERNEL_OK")
</pallas_src>

<mosaic_0001>
module attributes {stable_mosaic.version = 11 : i64} {
  func.func @_linear_kernel(%arg0: i32, %arg1: memref<8x512xf32, #tpu.memory_space<vmem>>, %arg2: memref<512x10xf32, #tpu.memory_space<vmem>>, %arg3: memref<1x10xf32, #tpu.memory_space<vmem>>, %arg4: memref<8x10xf32, #tpu.memory_space<vmem>>) attributes {dimension_semantics = [#tpu.dimension_semantics<parallel>], iteration_bounds = array<i64: 1>, scalar_prefetch = 0 : i64, scratch_operands = 0 : i64, tpu.core_type = #tpu.core_type<tc>, window_params = [{transform_indices = @transform_0, window_bounds = array<i64: 8, 512>}, {pipeline_mode = #tpu.pipeline_mode<synchronous>, transform_indices = @transform_1, window_bounds = array<i64: 512, 10>}, {pipeline_mode = #tpu.pipeline_mode<synchronous>, transform_indices = @transform_2, window_bounds = array<i64: 1, 10>}, {transform_indices = @transform_3, window_bounds = array<i64: 8, 10>}]} {
    %c0 = arith.constant 0 : index
    %c0_0 = arith.constant 0 : index
    %0 = vector.load %arg1[%c0, %c0_0] : memref<8x512xf32, #tpu.memory_space<vmem>>, vector<8x512xf32>
    %c0_1 = arith.constant 0 : index
    %c0_2 = arith.constant 0 : index
    %1 = vector.load %arg2[%c0_1, %c0_2] : memref<512x10xf32, #tpu.memory_space<vmem>>, vector<512x10xf32>
    %cst = arith.constant dense<0.000000e+00> : vector<8x10xf32>
    %2 = tpu.matmul %0, %1, %cst {dimension_numbers = #tpu.dot_dimension_numbers<[1], [0], [0], [1], [0, 0, 1, 1], [], []>, precision = #tpu.contract_precision<fp32>} : vector<8x512xf32>, vector<512x10xf32>, vector<8x10xf32> -> vector<8x10xf32>
    %c0_3 = arith.constant 0 : index
    %c0_4 = arith.constant 0 : index
    %3 = vector.load %arg3[%c0_3, %c0_4] : memref<1x10xf32, #tpu.memory_space<vmem>>, vector<1x10xf32>
    %4 = vector.broadcast %3 : vector<1x10xf32> to vector<8x10xf32>
    %5 = arith.addf %2, %4 : vector<8x10xf32>
    %c0_5 = arith.constant 0 : index
    %c0_6 = arith.constant 0 : index
    %6 = vector.load %arg4[%c0_5, %c0_6] : memref<8x10xf32, #tpu.memory_space<vmem>>, vector<8x10xf32>
    tpu.vector_store %arg4[%c0_5, %c0_6], %5 {strides = array<i32>} : memref<8x10xf32, #tpu.memory_space<vmem>>, vector<8x10xf32>,
    return
  }
  func.func @transform_0(%arg0: i32) -> (i32, i32) {
    %c0_i32 = arith.constant 0 : i32
    %c0_i32_0 = arith.constant 0 : i32
    return %arg0, %c0_i32 : i32, i32
  }
  func.func @transform_1(%arg0: i32) -> (i32, i32) {
    %c0_i32 = arith.constant 0 : i32
    %c0_i32_0 = arith.constant 0 : i32
    %c0_i32_1 = arith.constant 0 : i32
    return %c0_i32, %c0_i32_0 : i32, i32
  }
  func.func @transform_2(%arg0: i32) -> (i32, i32) {
    %c0_i32 = arith.constant 0 : i32
    %c0_i32_0 = arith.constant 0 : i32
    %c0_i32_1 = arith.constant 0 : i32
    return %c0_i32, %c0_i32_0 : i32, i32
  }
  func.func @transform_3(%arg0: i32) -> (i32, i32) {
    %c0_i32 = arith.constant 0 : i32
    %c0_i32_0 = arith.constant 0 : i32
    return %arg0, %c0_i32 : i32, i32
  }
}

</mosaic_0001>

<bundles_post_ra>
// kernel: sup_head_forward.1
= control target key start
LH: loop header
LB: loop body
LE: loop exit
PB: predicated region body
PF: predicated region fallthrough
CT: control target
= control target key end

     0   :  { %vm1813_vm0 = vcmask 80896   ;;  %s3723_s1 = inlined_call_operand.vmem [shape: f32[512,10], index: 1, kind: input, shape index: {}]   ;;  %s3724_s0 = inlined_call_operand.vmem [shape: f32[8,512], index: 0, kind: input, shape index: {}]   ;;  %s3725_s2 = inlined_call_operand.vmem [shape: f32[1,10], index: 2, kind: input, shape index: {}]   ;;  %s3726_s3 = inlined_call_operand.vmem [shape: f32[8,10], index: 3, kind: output, shape index: {}]  }
   0x1   :  { %v34_v0 = vld [vmem:[%s3723_s1 + $0x80] sm:$0xff]  ;;  %v35_v1 = vld [vmem:[%s3723_s1 + $0x88] sm:$0xff]  ;;  %v36_v7 = vld [vmem:[%s3723_s1 + $0x90] sm:$0xff] }
   0x2   :  { %v18_v2 = vld [vmem:[%s3723_s1] sm:$0xff]  ;;  %v138_v3 = vand.u32 4294901760, %v34_v0  ;;  %v141_v4 = vand.u32 4294901760, %v35_v1  ;;  %v19_v5 = vld [vmem:[%s3723_s1 + $0x8] sm:$0xff]  ;;  %v37_v8 = vld [vmem:[%s3723_s1 + $0x98] sm:$0xff]  ;;  %v144_v10 = vand.u32 4294901760, %v36_v7 }
   0x3   :  { %v90_v6 = vand.u32 4294901760, %v18_v2  ;;  %v93_v9 = vand.u32 4294901760, %v19_v5  ;;  %v147_v11 = vand.u32 4294901760, %v37_v8  ;;  %v20_v12 = vld [vmem:[%s3723_s1 + $0x10] sm:$0xff]  ;;  %v21_v13 = vld [vmem:[%s3723_s1 + $0x18] sm:$0xff]  ;;  %v38_v18 = vld [vmem:[%s3723_s1 + $0xa0] sm:$0xff] }
   0x4   :  { %v2668_v14 = vpack.c.bf16 %v141_v4, %v138_v3  ;;  %v96_v16 = vand.u32 4294901760, %v20_v12  ;;  %v99_v17 = vand.u32 4294901760, %v21_v13  ;;  %v39_v19 = vld [vmem:[%s3723_s1 + $0xa8] sm:$0xff]  ;;  %v22_v23 = vld [vmem:[%s3723_s1 + $0x20] sm:$0xff]  ;;  %v2691_v25 = vsub.f32 %v36_v7, %v144_v10  ;;  %v40_v37 = vld [vmem:[%s3723_s1 + $0xb0] sm:$0xff] }
   0x5   :  { %v2670_v15 = vsub.f32 %v18_v2, %v90_v6  ;;  %v2678_v20 = vpack.c.bf16 %v93_v9, %v90_v6  ;;  %v2680_v21 = vsub.f32 %v19_v5, %v93_v9  ;;  %v2682_v22 = vpack.c.bf16 %v147_v11, %v144_v10  ;;  %v23_v24 = vld [vmem:[%s3723_s1 + $0x28] sm:$0xff]  ;;  %v41_v42 = vld [vmem:[%s3723_s1 + $0xb8] sm:$0xff]  ;;  %v24_v55 = vld [vmem:[%s3723_s1 + $0x30] sm:$0xff] }
   0x6   :  { %2241 = vmatprep.subr.bf16.mxu0 %v2668_v14  ;;  %v2693_v26 = vsub.f32 %v37_v8, %v147_v11  ;;  %v2695_v27 = vpack.c.bf16 %v99_v17, %v96_v16  ;;  %v2697_v28 = vsub.f32 %v20_v12, %v96_v16  ;;  %v150_v29 = vand.u32 4294901760, %v38_v18  ;;  %v25_v56 = vld [vmem:[%s3723_s1 + $0x38] sm:$0xff]  ;;  %v42_v5 = vld [vmem:[%s3723_s1 + $0xc0] sm:$0xff]  ;;  %v43_v6 = vld [vmem:[%s3723_s1 + $0xc8] sm:$0xff] }
   0x7   :  { %2243 = vmatpush3.bf16.msra.mxu0 %v2678_v20  ;;  %v153_v30 = vand.u32 4294901760, %v39_v19  ;;  %v2700_v31 = vsub.f32 %v34_v0, %v138_v3  ;;  %v2702_v32 = vsub.f32 %v35_v1, %v141_v4  ;;  %v102_v33 = vand.u32 4294901760, %v22_v23  ;;  %v26_v11 = vld [vmem:[%s3723_s1 + $0x40] sm:$0xff] }
   0x8   :  { %2245 = vmatprep.subr.bf16.mxu0 %v2682_v22  ;;  %v105_v34 = vand.u32 4294901760, %v23_v24  ;;  %v3743_v35 = vand.u32 4294901760, %v2670_v15  ;;  %v3742_v36 = vand.u32 4294901760, %v2680_v21  ;;  %v2710_v38 = vsub.f32 %v21_v13, %v99_v17 }
   0x9   :  { %v2712_v39 = vpack.c.bf16 %v153_v30, %v150_v29  ;;  %v2714_v40 = vsub.f32 %v38_v18, %v150_v29  ;;  %v3748_v41 = vand.u32 4294901760, %v2700_v31  ;;  %v2720_v43 = vsub.f32 %v39_v19, %v153_v30  ;;  %v27_v29 = vld [vmem:[%s3723_s1 + $0x48] sm:$0xff] }
   0xa   :  { %v3745_v44 = vand.u32 4294901760, %v2702_v32  ;;  %v2723_v45 = vpack.c.bf16 %v105_v34, %v102_v33  ;;  %v2725_v46 = vsub.f32 %v22_v23, %v102_v33  ;;  %v205_v48 = vsub.f32 %v2670_v15, %v3743_v35 }
   0xb   :  { %2247 = vmatpush3.bf16.msra.mxu0 %v2695_v27  ;;  %v317_v47 = vsub.f32 %v2700_v31, %v3748_v41  ;;  %v212_v49 = vsub.f32 %v2680_v21, %v3742_v36  ;;  %v156_v50 = vand.u32 4294901760, %v40_v37  ;;  %v159_v52 = vand.u32 4294901760, %v41_v42 }
   0xc   :  { %2249 = vmatprep.subr.bf16.mxu0 %v2712_v39  ;;  %v324_v51 = vsub.f32 %v2702_v32, %v3745_v44  ;;  %v3740_v53 = vand.u32 4294901760, %v2691_v25  ;;  %v3739_v54 = vand.u32 4294901760, %v2693_v26  ;;  %v2749_v58 = vsub.f32 %v23_v24, %v105_v34 }
   0xd   :  { %v318_v57 = vand.u32 4294901760, %v317_v47  ;;  %v206_v59 = vand.u32 4294901760, %v205_v48  ;;  %v213_v60 = vand.u32 4294901760, %v212_v49  ;;  %v2751_v62 = vpack.c.bf16 %v159_v52, %v156_v50 }
   0xe   :  { %v325_v61 = vand.u32 4294901760, %v324_v51  ;;  %v2753_v63 = vsub.f32 %v40_v37, %v156_v50  ;;  %v331_v0 = vsub.f32 %v2691_v25, %v3740_v53  ;;  %v338_v2 = vsub.f32 %v2693_v26, %v3739_v54 }
   0xf   :  { %2251 = vmatpush3.bf16.msra.mxu0 %v2723_v45  ;;  %v2274_v1 = vpack.c.bf16 %v213_v60, %v206_v59  ;;  %v108_v3 = vand.u32 4294901760, %v24_v55  ;;  %v111_v4 = vand.u32 4294901760, %v25_v56  ;;  %v3738_v9 = vand.u32 4294901760, %v2697_v28 }
  0x10   :  { %v2272_v7 = vpack.c.bf16 %v325_v61, %v318_v57  ;;  %2253 = vmatprep.subr.bf16.mxu0 %v2751_v62  ;;  %v332_v8 = vand.u32 4294901760, %v331_v0  ;;  %v3735_v10 = vand.u32 4294901760, %v2710_v38  ;;  %v2774_v12 = vsub.f32 %v41_v42, %v159_v52  ;;  %v45_v57 = vld [vmem:[%s3723_s1 + $0xd8] sm:$0xff] }
  0x11   :  { %v339_v13 = vand.u32 4294901760, %v338_v2  ;;  %v2776_v16 = vpack.c.bf16 %v111_v4, %v108_v3  ;;  %v2778_v17 = vsub.f32 %v24_v55, %v108_v3  ;;  %v219_v18 = vsub.f32 %v2697_v28, %v3738_v9 }
  0x12   :  { %2273 = vmatprep.subr.bf16.mxu1 %v2272_v7  ;;  %v226_v19 = vsub.f32 %v2710_v38, %v3735_v10  ;;  %v162_v23 = vand.u32 4294901760, %v42_v5  ;;  %v165_v24 = vand.u32 4294901760, %v43_v6  ;;  %v3733_v33 = vand.u32 4294901760, %v2714_v40 }
  0x13   :  { %2275 = vmatpush3.bf16.msra.mxu1 %v2274_v1  ;;  %v2276_v30 = vpack.c.bf16 %v339_v13, %v332_v8  ;;  %2255 = vmatpush3.bf16.msra.mxu0 %v2776_v16  ;;  %v3732_v34 = vand.u32 4294901760, %v2720_v43  ;;  %v114_v37 = vand.u32 4294901760, %v26_v11  ;;  %v2792_v42 = vsub.f32 %v25_v56, %v111_v4  ;;  %v44_v56 = vld [vmem:[%s3723_s1 + $0xd0] sm:$0xff] }
  0x14   :  { %v220_v47 = vand.u32 4294901760, %v219_v18  ;;  %v227_v48 = vand.u32 4294901760, %v226_v19  ;;  %v2794_v49 = vpack.c.bf16 %v165_v24, %v162_v23  ;;  %v2796_v50 = vsub.f32 %v42_v5, %v162_v23  ;;  %v28_v1 = vld [vmem:[%s3723_s1 + $0x50] sm:$0xff]  ;;  %v29_v18 = vld [vmem:[%s3723_s1 + $0x58] sm:$0xff] }
  0x15   :  { %2277 = vmatprep.subr.bf16.mxu1 %v2276_v30  ;;  %v345_v51 = vsub.f32 %v2714_v40, %v3733_v33  ;;  %v352_v52 = vsub.f32 %v2720_v43, %v3732_v34  ;;  %v117_v55 = vand.u32 4294901760, %v27_v29  ;;  %v2811_v60 = vsub.f32 %v43_v6, %v165_v24 }
  0x16   :  { %v2278_v59 = vpack.c.bf16 %v227_v48, %v220_v47  ;;  %2257 = vmatprep.subr.bf16.mxu0 %v2794_v49  ;;  %v3730_v61 = vand.u32 4294901760, %v2725_v46  ;;  %v3729_v0 = vand.u32 4294901760, %v2749_v58  ;;  %v2820_v5 = vsub.f32 %v26_v11, %v114_v37 }
  0x17   :  { %v346_v2 = vand.u32 4294901760, %v345_v51  ;;  %v353_v3 = vand.u32 4294901760, %v352_v52  ;;  %v2818_v4 = vpack.c.bf16 %v117_v55, %v114_v37  ;;  %v168_v8 = vand.u32 4294901760, %v44_v56 }
  0x18   :  { %2279 = vmatpush3.bf16.msra.mxu1 %v2278_v59  ;;  %v233_v6 = vsub.f32 %v2725_v46, %v3730_v61  ;;  %v240_v7 = vsub.f32 %v2749_v58, %v3729_v0  ;;  %v171_v13 = vand.u32 4294901760, %v45_v57  ;;  %v3728_v11 = vand.u32 4294901760, %v2753_v63 }
  0x19   :  { %v2280_v19 = vpack.c.bf16 %v353_v3, %v346_v2  ;;  %2259 = vmatpush3.bf16.msra.mxu0 %v2818_v4  ;;  %v3727_v23 = vand.u32 4294901760, %v2774_v12  ;;  %v120_v24 = vand.u32 4294901760, %v28_v1  ;;  %v2834_v30 = vsub.f32 %v27_v29, %v117_v55  ;;  %v46_v29 = vld [vmem:[%s3723_s1 + $0xe0] sm:$0xff]  ;;  %v47_v55 = vld [vmem:[%s3723_s1 + $0xe8] sm:$0xff] }
  0x1a   :  { %v234_v37 = vand.u32 4294901760, %v233_v6  ;;  %v241_v47 = vand.u32 4294901760, %v240_v7  ;;  %v2836_v48 = vpack.c.bf16 %v171_v13, %v168_v8  ;;  %v2838_v51 = vsub.f32 %v44_v56, %v168_v8  ;;  %v30_v8 = vld [vmem:[%s3723_s1 + $0x60] sm:$0xff] }
  0x1b   :  { %2281 = vmatprep.subr.bf16.mxu1 %v2280_v19  ;;  %v359_v52 = vsub.f32 %v2753_v63, %v3728_v11  ;;  %v366_v59 = vsub.f32 %v2774_v12, %v3727_v23  ;;  %v123_v2 = vand.u32 4294901760, %v29_v18  ;;  %v2853_v56 = vsub.f32 %v45_v57, %v171_v13 }
  0x1c   :  { %v2282_v3 = vpack.c.bf16 %v241_v47, %v234_v37  ;;  %2261 = vmatprep.subr.bf16.mxu0 %v2836_v48  ;;  %v3731_v6 = vand.u32 4294901760, %v2778_v17  ;;  %v3734_v7 = vand.u32 4294901760, %v2792_v42  ;;  %v2862_v0 = vsub.f32 %v28_v1, %v120_v24 }
  0x1d   :  { %v360_v19 = vand.u32 4294901760, %v359_v52  ;;  %v367_v23 = vand.u32 4294901760, %v366_v59  ;;  %v2860_v11 = vpack.c.bf16 %v123_v2, %v120_v24  ;;  %v174_v37 = vand.u32 4294901760, %v46_v29  ;;  %v31_v52 = vld [vmem:[%s3723_s1 + $0x68] sm:$0xff] }
  0x1e   :  { %2283 = vmatpush3.bf16.msra.mxu1 %v2282_v3  ;;  %v247_v57 = vsub.f32 %v2778_v17, %v3731_v6  ;;  %v254_v13 = vsub.f32 %v2792_v42, %v3734_v7  ;;  %v177_v47 = vand.u32 4294901760, %v47_v55  ;;  %v3737_v1 = vand.u32 4294901760, %v2796_v50 }
  0x1f   :  { %3815 = vst [vmem:[#allocation2_spill] sm:$0xff] %v2860_v11  ;;  %v2284_v59 = vpack.c.bf16 %v367_v23, %v360_v19  ;;  %2263 = vmatpush3.bf16.msra.mxu0 %v2860_v11  ;;  %v3736_v24 = vand.u32 4294901760, %v2811_v60  ;;  %v126_v3 = vand.u32 4294901760, %v30_v8  ;;  %v2876_v61 = vsub.f32 %v29_v18, %v123_v2  ;;  %v48_v18 = vld [vmem:[%s3723_s1 + $0xf0] sm:$0xff]  ;;  %v49_v2 = vld [vmem:[%s3723_s1 + $0xf8] sm:$0xff] }
  0x20   :  { %v248_v6 = vand.u32 4294901760, %v247_v57  ;;  %v255_v34 = vand.u32 4294901760, %v254_v13  ;;  %v2878_v33 = vpack.c.bf16 %v177_v47, %v174_v37  ;;  %v2880_v7 = vsub.f32 %v46_v29, %v174_v37 }
  0x21   :  { %2285 = vmatprep.subr.bf16.mxu1 %v2284_v59  ;;  %v373_v23 = vsub.f32 %v2796_v50, %v3737_v1  ;;  %v380_v19 = vsub.f32 %v2811_v60, %v3736_v24  ;;  %v129_v10 = vand.u32 4294901760, %v31_v52  ;;  %v2895_v29 = vsub.f32 %v47_v55, %v177_v47  ;;  %v32_v59 = vld [vmem:[%s3723_s1 + $0x70] sm:$0xff] }
  0x22   :  { %3816 = vst [vmem:[#allocation3_spill] sm:$0xff] %v2878_v33  ;;  %v2286_v57 = vpack.c.bf16 %v255_v34, %v248_v6  ;;  %2265 = vmatprep.subr.bf16.mxu0 %v2878_v33  ;;  %v3741_v13 = vand.u32 4294901760, %v2820_v5  ;;  %v3744_v37 = vand.u32 4294901760, %v2834_v30  ;;  %v2904_v54 = vsub.f32 %v30_v8, %v126_v3 }
  0x23   :  { %v374_v24 = vand.u32 4294901760, %v373_v23  ;;  %v381_v1 = vand.u32 4294901760, %v380_v19  ;;  %v2902_v9 = vpack.c.bf16 %v129_v10, %v126_v3  ;;  %v180_v6 = vand.u32 4294901760, %v48_v18  ;;  %v33_v23 = vld [vmem:[%s3723_s1 + $0x78] sm:$0xff] }
  0x24   :  { %2287 = vmatpush3.bf16.msra.mxu1 %v2286_v57  ;;  %v261_v34 = vsub.f32 %v2820_v5, %v3741_v13  ;;  %v268_v55 = vsub.f32 %v2834_v30, %v3744_v37  ;;  %v183_v47 = vand.u32 4294901760, %v49_v2  ;;  %v3747_v8 = vand.u32 4294901760, %v2838_v51 }
  0x25   :  { %3817 = vst [vmem:[#allocation4_spill] sm:$0xff] %v2902_v9  ;;  %v2288_v19 = vpack.c.bf16 %v381_v1, %v374_v24  ;;  %2267 = vmatpush3.bf16.msra.mxu0 %v2902_v9  ;;  %v3746_v3 = vand.u32 4294901760, %v2853_v56  ;;  %v132_v57 = vand.u32 4294901760, %v32_v59  ;;  %v2918_v53 = vsub.f32 %v31_v52, %v129_v10  ;;  %v15_v10 = vld [vmem:[%s3724_s0 + $0x8] sm:$0xff] }
  0x26   :  { %v262_v13 = vand.u32 4294901760, %v261_v34  ;;  %v269_v36 = vand.u32 4294901760, %v268_v55  ;;  %v2920_v35 = vpack.c.bf16 %v183_v47, %v180_v6  ;;  %v2922_v37 = vsub.f32 %v48_v18, %v180_v6  ;;  %v14_v6 = vld [vmem:[%s3724_s0] sm:$0xff] }
  0x27   :  { %2289 = vmatprep.subr.bf16.mxu1 %v2288_v19  ;;  %v387_v1 = vsub.f32 %v2838_v51, %v3747_v8  ;;  %v394_v24 = vsub.f32 %v2853_v56, %v3746_v3  ;;  %v135_v44 = vand.u32 4294901760, %v33_v23  ;;  %v2934_v34 = vsub.f32 %v49_v2, %v183_v47 }
  0x28   :  { %3818 = vst [vmem:[#allocation5_spill] sm:$0xff] %v2920_v35  ;;  %v2290_v52 = vpack.c.bf16 %v269_v36, %v262_v13  ;;  %2269 = vmatprep.subr.bf16.mxu0 %v2920_v35  ;;  %v3751_v18 = vand.u32 4294901760, %v2862_v0  ;;  %v3752_v55 = vand.u32 4294901760, %v2876_v61  ;;  %v2943_v41 = vsub.f32 %v32_v59, %v132_v57 }
  0x29   :  { %v388_v19 = vand.u32 4294901760, %v387_v1  ;;  %v395_v3 = vand.u32 4294901760, %v394_v24  ;;  %v2941_v8 = vpack.c.bf16 %v135_v44, %v132_v57  ;;  %v2951_v13 = vand.u32 4294901760, %v15_v10 }
  0x2a   :  { %2291 = vmatpush3.bf16.msra.mxu1 %v2290_v52  ;;  %v275_v36 = vsub.f32 %v2862_v0, %v3751_v18  ;;  %v282_v2 = vsub.f32 %v2876_v61, %v3752_v55  ;;  %v3755_v47 = vand.u32 4294901760, %v2880_v7  ;;  %v3761_v1 = vand.u32 4294901760, %v2895_v29 }
  0x2b   :  { %3819 = vst [vmem:[#allocation6_spill] sm:$0xff] %v2941_v8  ;;  %3820 = vst [vmem:[#allocation7_spill] sm:$0xff] %v2951_v13  ;;  %v2292_v35 = vpack.c.bf16 %v395_v3, %v388_v19  ;;  %2271 = vmatpush3.bf16.msra.mxu0 %v2941_v8  ;;  %v2304_v59 = vpack.c.bf16 %v2702_v32, %v2700_v31  ;;  %v2958_v57 = vand.u32 4294901760, %v14_v6  ;;  %426 = vmatprep.mubr.f32.mxu1 %v2951_v13 }
  0x2c   :  { %v276_v24 = vand.u32 4294901760, %v275_v36  ;;  %v283_v52 = vand.u32 4294901760, %v282_v2  ;;  %v2961_v18 = vsub.f32 %v15_v10, %v2951_v13  ;;  %v401_v55 = vsub.f32 %v2880_v7, %v3755_v47 }
  0x2d   :  { %2293 = vmatprep.subr.bf16.mxu1 %v2292_v35  ;;  %v408_v3 = vsub.f32 %v2895_v29, %v3761_v1  ;;  %2305 = vmatprep.subr.bf16.mxu0 %v2304_v59  ;;  %v2971_v19 = vsub.f32 %v14_v6, %v2958_v57  ;;  %v3760_v36 = vand.u32 4294901760, %v2904_v54  ;;  %v3762_v10 = vand.u32 4294901760, %v2918_v53 }
  0x2e   :  { %v2975_v2 = vsub.f32 %v33_v23, %v135_v44  ;;  %v2294_v8 = vpack.c.bf16 %v283_v52, %v276_v24  ;;  %v3763_v47 = vand.u32 4294901760, %v2961_v18  ;;  %v402_v9 = vand.u32 4294901760, %v401_v55 }
  0x2f   :  { %v409_v13 = vand.u32 4294901760, %v408_v3  ;;  %v193_v35 = vand.u32 4294901760, %v2971_v19  ;;  %v289_v59 = vsub.f32 %v2904_v54, %v3760_v36  ;;  %v296_v6 = vsub.f32 %v2918_v53, %v3762_v10 }
  0x30   :  { %2295 = vmatpush3.bf16.msra.mxu1 %v2294_v8  ;;  %v188_v44 = vsub.f32 %v2961_v18, %v3763_v47  ;;  %v2306_v23 = vpack.c.bf16 %v2680_v21, %v2670_v15  ;;  %v3768_v55 = vand.u32 4294901760, %v2922_v37  ;;  %v3771_v24 = vand.u32 4294901760, %v2934_v34 }
  0x31   :  { %v2296_v52 = vpack.c.bf16 %v409_v13, %v402_v9  ;;  %v194_v3 = vsub.f32 %v2971_v19, %v193_v35  ;;  %v290_v36 = vand.u32 4294901760, %v289_v59  ;;  %v297_v1 = vand.u32 4294901760, %v296_v6 }
  0x32   :  { %v189_v10 = vand.u32 4294901760, %v188_v44  ;;  %v415_v8 = vsub.f32 %v2922_v37, %v3768_v55  ;;  %v422_v47 = vsub.f32 %v2934_v34, %v3771_v24  ;;  %v3770_v33 = vand.u32 4294901760, %v2943_v41 }
  0x33   :  { %2297 = vmatprep.subr.bf16.mxu1 %v2296_v52  ;;  %v195_v11 = vand.u32 4294901760, %v194_v3  ;;  %v2298_v9 = vpack.c.bf16 %v297_v1, %v290_v36  ;;  %v2308_v13 = vpack.c.bf16 %v2693_v26, %v2691_v25  ;;  %v3769_v59 = vand.u32 4294901760, %v2975_v2 }
  0x34   :  { %190 = vmatprep.mubr.f32.mxu0 %v189_v10  ;;  %v416_v6 = vand.u32 4294901760, %v415_v8  ;;  %v423_v44 = vand.u32 4294901760, %v422_v47  ;;  %v303_v55 = vsub.f32 %v2943_v41, %v3770_v33  ;;  %v2310_v3 = vpack.c.bf16 %v2710_v38, %v2697_v28 }
  0x35   :  { %196 = vmatmul.mubr.f32.vlgmr.msra.gmra.mrb[0].mxu0 %v195_v11  ;;  %2299 = vmatpush3.bf16.msra.mxu1 %v2298_v9  ;;  %v310_v52 = vsub.f32 %v2975_v2, %v3769_v59  ;;  %v2312_v10 = vpack.c.bf16 %v2720_v43, %v2714_v40  ;;  %v2314_v11 = vpack.c.bf16 %v2749_v58, %v2725_v46  ;;  %v3822_v9 = vand.u32 4294901760, %v2702_v32 }
  0x36   :  { %2307 = vmatpush3.bf16.msra.mxu0 %v2306_v23  ;;  %v2300_v1 = vpack.c.bf16 %v423_v44, %v416_v6  ;;  %v304_v36 = vand.u32 4294901760, %v303_v55  ;;  %563 = vmatprep.mubr.f32.mxu0 %v2961_v18  ;;  %v2316_v8 = vpack.c.bf16 %v2774_v12, %v2753_v63  ;;  %v3821_v55 = vand.u32 4294901760, %v2700_v31 }
  0x37   :  { %2309 = vmatprep.subr.bf16.mxu0 %v2308_v13  ;;  %v311_v47 = vand.u32 4294901760, %v310_v52  ;;  %v3823_v44 = vand.u32 4294901760, %v2670_v15  ;;  %v3824_v13 = vand.u32 4294901760, %v2680_v21  ;;  %v3825_v59 = vand.u32 4294901760, %v2691_v25 }
  0x38   :  { %2301 = vmatprep.subr.bf16.mxu1 %v2300_v1  ;;  %v2368_v6 = vpack.c.bf16 %v3822_v9, %v3821_v55  ;;  %v3826_v1 = vand.u32 4294901760, %v2693_v26  ;;  %v3827_v24 = vand.u32 4294901760, %v2697_v28  ;;  %v3829_v31 = vand.u32 4294901760, %v2714_v40 }
  0x39   :  { %v2302_v23 = vpack.c.bf16 %v311_v47, %v304_v36  ;;  %v2370_v52 = vpack.c.bf16 %v3824_v13, %v3823_v44  ;;  %v3828_v36 = vand.u32 4294901760, %v2710_v38  ;;  %v3830_v32 = vand.u32 4294901760, %v2720_v43  ;;  %v3844_v13 = vld [vmem:[#allocation7_spill] sm:$0xff] }
  0x3a   :  { %v2372_v33 = vpack.c.bf16 %v3826_v1, %v3825_v59  ;;  %2311 = vmatpush3.bf16.msra.mxu0 %v2310_v3  ;;  %v3831_v15 = vand.u32 4294901760, %v2725_v46  ;;  %v3832_v21 = vand.u32 4294901760, %v2749_v58  ;;  %v3833_v25 = vand.u32 4294901760, %v2753_v63  ;;  %v67_v1 = vld [vmem:[%s3723_s1 + $0x188] sm:$0xff] }
  0x3b   :  { %v2374_v47 = vpack.c.bf16 %v3828_v36, %v3827_v24  ;;  %v2376_v55 = vpack.c.bf16 %v3830_v32, %v3829_v31  ;;  %v3834_v26 = vand.u32 4294901760, %v2774_v12  ;;  %2303 = vmatpush3.bf16.msra.mxu1 %v2302_v23  ;;  %2313 = vmatprep.subr.bf16.mxu0 %v2312_v10  ;;  %v3835_v28 = vand.u32 4294901760, %v2778_v17  ;;  %v50_v36 = vld [vmem:[%s3723_s1 + $0x100] sm:$0xff]  ;;  %v3845_v31 = vld [vmem:[#allocation4_spill] sm:$0xff]  ;;  %v3846_v32 = vld [vmem:[#allocation5_spill] sm:$0xff] }
  0x3c   :  { %v3044_v9 = vpack.c.bf16 %v3832_v21, %v3831_v15  ;;  %v3836_v38 = vand.u32 4294901760, %v2792_v42  ;;  %v3837_v43 = vand.u32 4294901760, %v2796_v50  ;;  %v3838_v46 = vand.u32 4294901760, %v2811_v60  ;;  %2337 = vmatprep.subr.bf16.mxu1 %v2668_v14 }
  0x3d   :  { %v3050_v59 = vpack.c.bf16 %v3834_v26, %v3833_v25  ;;  %v3839_v63 = vand.u32 4294901760, %v2820_v5  ;;  %v3840_v12 = vand.u32 4294901760, %v2834_v30  ;;  %v2318_v3 = vpack.c.bf16 %v2792_v42, %v2778_v17  ;;  %v3847_v26 = vld [vmem:[#allocation6_spill] sm:$0xff] }
  0x3e   :  { %v3056_v40 = vpack.c.bf16 %v3836_v38, %v3835_v28  ;;  %v3062_v58 = vpack.c.bf16 %v3838_v46, %v3837_v43  ;;  %428 = vmatmul.mubr.f32.vlgmr.msra.gmra.mrb[0].mxu1 %v2958_v57  ;;  %2315 = vmatpush3.bf16.msra.mxu0 %v2314_v11  ;;  %v2320_v10 = vpack.c.bf16 %v2811_v60, %v2796_v50  ;;  %v3841_v23 = vand.u32 4294901760, %v2961_v18  ;;  %v3842_v18 = vld [vmem:[#allocation2_spill] sm:$0xff]  ;;  %v3843_v11 = vld [vmem:[#allocation3_spill] sm:$0xff]  ;;  %v68_v28 = vld [vmem:[%s3723_s1 + $0x190] sm:$0xff] }
  0x3f   :  { %v3068_v24 = vpack.c.bf16 %v3840_v12, %v3839_v63  ;;  %2339 = vmatpush3.bf16.msra.mxu1 %v2678_v20  ;;  %2317 = vmatprep.subr.bf16.mxu0 %v2316_v8  ;;  %v2322_v44 = vpack.c.bf16 %v2834_v30, %v2820_v5  ;;  %v2324_v17 = vpack.c.bf16 %v2853_v56, %v2838_v51  ;;  %v66_v8 = vld [vmem:[%s3723_s1 + $0x180] sm:$0xff]  ;;  %v1003_v15 = vand.u32 4294901760, %v67_v1  ;;  %v69_v38 = vld [vmem:[%s3723_s1 + $0x198] sm:$0xff]  ;;  %v52_v43 = vld [vmem:[%s3723_s1 + $0x110] sm:$0xff] }
  0x40   :  { %2341 = vmatprep.subr.bf16.mxu1 %v2682_v22  ;;  %670 = vmatprep.mubr.f32.mxu1 %v3841_v23  ;;  %v2326_v42 = vpack.c.bf16 %v2876_v61, %v2862_v0  ;;  %v2328_v50 = vpack.c.bf16 %v2895_v29, %v2880_v7  ;;  %v2330_v60 = vpack.c.bf16 %v2918_v53, %v2904_v54  ;;  %v952_v21 = vand.u32 4294901760, %v50_v36 }
  0x41   :  { %v2332_v5 = vpack.c.bf16 %v2934_v34, %v2922_v37  ;;  %v2334_v30 = vpack.c.bf16 %v2975_v2, %v2943_v41  ;;  %v3849_v12 = vand.u32 4294901760, %v2853_v56  ;;  %v1009_v23 = vand.u32 4294901760, %v69_v38 }
  0x42   :  { %2319 = vmatpush3.bf16.msra.mxu0 %v2318_v3  ;;  %v3138_v46 = vsub.f32 %v50_v36, %v952_v21 }
  0x43   :  { %2343 = vmatpush3.bf16.msra.mxu1 %v2695_v27  ;;  %2321 = vmatprep.subr.bf16.mxu0 %v2320_v10  ;;  %v1006_v10 = vand.u32 4294901760, %v68_v28 }
  0x44   :  { %2345 = vmatprep.subr.bf16.mxu1 %v2712_v39 }
  0x45   :  { %v3205_v36 = vpack.c.bf16 %v1009_v23, %v1006_v10 }
  0x46   :  { %2323 = vmatpush3.bf16.msra.mxu0 %v2322_v44  ;;  %v3850_v44 = vand.u32 4294901760, %v2862_v0  ;;  %v3855_v0 = vand.u32 4294901760, %v2918_v53  ;;  %v17_v53 = vld [vmem:[%s3724_s0 + $0x18] sm:$0xff] }
  0x47   :  { %2347 = vmatpush3.bf16.msra.mxu1 %v2723_v45  ;;  %2325 = vmatprep.subr.bf16.mxu0 %v2324_v17  ;;  %v3851_v17 = vand.u32 4294901760, %v2876_v61  ;;  %v3854_v61 = vand.u32 4294901760, %v2904_v54  ;;  %3860 = vst [vmem:[#allocation2_spill] sm:$0xff] %v3205_v36 }
  0x48   :  { %2349 = vmatprep.subr.bf16.mxu1 %v2751_v62 }
  0x4a   :  { %2327 = vmatpush3.bf16.msra.mxu0 %v2326_v42  ;;  %v2390_v42 = vpack.c.bf16 %v3851_v17, %v3850_v44  ;;  %v3215_v44 = vand.u32 4294901760, %v17_v53 }
  0x4b   :  { %2351 = vmatpush3.bf16.msra.mxu1 %v2776_v16  ;;  %2329 = vmatprep.subr.bf16.mxu0 %v2328_v50  ;;  %v70_v50 = vld [vmem:[%s3723_s1 + $0x1a0] sm:$0xff] }
  0x4c   :  { %2353 = vmatprep.subr.bf16.mxu1 %v2794_v49  ;;  %3862 = vst [vmem:[#allocation7_spill] sm:$0xff] %v3215_v44 }
  0x4e   :  { %2331 = vmatpush3.bf16.msra.mxu0 %v2330_v60 }
  0x4f   :  { %2355 = vmatpush3.bf16.msra.mxu1 %v2818_v4  ;;  %2333 = vmatprep.subr.bf16.mxu0 %v2332_v5  ;;  %v3858_v5 = vand.u32 4294901760, %v2943_v41  ;;  %v54_v41 = vld [vmem:[%s3723_s1 + $0x120] sm:$0xff] }
  0x50   :  { %2357 = vmatprep.subr.bf16.mxu1 %v2836_v48 }
  0x52   :  { %2335 = vmatpush3.bf16.msra.mxu0 %v2334_v30  ;;  %v3859_v30 = vand.u32 4294901760, %v2975_v2  ;;  %v3780_v2 = vand.u32 4294901760, %v3138_v46 }
  0x53   :  { %2359 = vmatpush3.bf16.msra.mxu1 %v3842_v18  ;;  %2369 = vmatprep.subr.bf16.mxu0 %v2368_v6  ;;  %v51_v6 = vld [vmem:[%s3723_s1 + $0x108] sm:$0xff] }
  0x54   :  { %2361 = vmatprep.subr.bf16.mxu1 %v3843_v11  ;;  %v955_v25 = vand.u32 4294901760, %v51_v6 }
  0x55   :  { %566 = vmatmul.mubr.f32.vlgmr.msra.gmra.mrb[2].mxu0 %v2971_v19  ;;  %v3852_v19 = vand.u32 4294901760, %v2880_v7  ;;  %v3172_v7 = vpack.c.bf16 %v3855_v0, %v3854_v61 }
  0x56   :  { %2371 = vmatpush3.bf16.msra.mxu0 %v2370_v52  ;;  %840 = vmatprep.mubr.f32.mxu0 %v3844_v13  ;;  %v1000_v52 = vand.u32 4294901760, %v66_v8  ;;  %v3140_v63 = vsub.f32 %v51_v6, %v955_v25  ;;  %v1012_v6 = vand.u32 4294901760, %v70_v50 }
  0x57   :  { %2363 = vmatpush3.bf16.msra.mxu1 %v3845_v31  ;;  %2373 = vmatprep.subr.bf16.mxu0 %v2372_v33 }
  0x58   :  { %2365 = vmatprep.subr.bf16.mxu1 %v3846_v32  ;;  %v3128_v33 = vsub.f32 %v66_v8, %v1000_v52  ;;  %v3184_v8 = vpack.c.bf16 %v3859_v30, %v3858_v5  ;;  %v3191_v54 = vpack.c.bf16 %v1003_v15, %v1000_v52  ;;  %v3243_v17 = vsub.f32 %v70_v50, %v1012_v6  ;;  %v57_v50 = vld [vmem:[%s3723_s1 + $0x138] sm:$0xff] }
  0x5a   :  { %2375 = vmatpush3.bf16.msra.mxu0 %v2374_v47  ;;  %v53_v47 = vld [vmem:[%s3723_s1 + $0x118] sm:$0xff] }
  0x5b   :  { %2367 = vmatpush3.bf16.msra.mxu1 %v3847_v26  ;;  %2377 = vmatprep.subr.bf16.mxu0 %v2376_v55  ;;  %v3136_v55 = vsub.f32 %v67_v1, %v1003_v15  ;;  %v961_v56 = vand.u32 4294901760, %v53_v47  ;;  %v3203_v1 = vpack.c.bf16 %v955_v25, %v952_v21  ;;  %v3209_v15 = vsub.f32 %v68_v28, %v1006_v10  ;;  %v73_v28 = vld [vmem:[%s3723_s1 + $0x1b8] sm:$0xff] }
  0x5c   :  { %2401 = vmatprep.subr.bf16.mxu1 %v2668_v14  ;;  %v3848_v14 = vand.u32 4294901760, %v2838_v51  ;;  %v958_v51 = vand.u32 4294901760, %v52_v43  ;;  %v964_v25 = vand.u32 4294901760, %v54_v41 }
  0x5e   :  { %674 = vmatmul.mubr.f32.vlgmr.msra.gmra.mrb[2].mxu1 %v193_v35  ;;  %2379 = vmatpush3.bf16.msra.mxu0 %v3044_v9  ;;  %v2388_v3 = vpack.c.bf16 %v3849_v12, %v3848_v14  ;;  %v3853_v35 = vand.u32 4294901760, %v2895_v29  ;;  %v3856_v29 = vand.u32 4294901760, %v2922_v37  ;;  %v3781_v37 = vand.u32 4294901760, %v3136_v55 }
  0x5f   :  { %2403 = vmatpush3.bf16.msra.mxu1 %v2678_v20  ;;  %2381 = vmatprep.subr.bf16.mxu0 %v3050_v59  ;;  %v71_v20 = vld [vmem:[%s3723_s1 + $0x1a8] sm:$0xff]  ;;  %v3857_v59 = vand.u32 4294901760, %v2934_v34  ;;  %v3211_v14 = vsub.f32 %v69_v38, %v1009_v23  ;;  %v3213_v12 = vpack.c.bf16 %v961_v56, %v958_v51  ;;  %v3229_v38 = vsub.f32 %v53_v47, %v961_v56 }
  0x60   :  { %v3159_v9 = vpack.c.bf16 %v3853_v35, %v3852_v19  ;;  %2405 = vmatprep.subr.bf16.mxu1 %v2682_v22  ;;  %944 = vmatprep.mubr.f32.mxu1 %v3844_v13  ;;  %v3784_v22 = vand.u32 4294901760, %v3128_v33  ;;  %v55_v34 = vld [vmem:[%s3723_s1 + $0x128] sm:$0xff]  ;;  %v3779_v13 = vand.u32 4294901760, %v3140_v63  ;;  %v1015_v52 = vand.u32 4294901760, %v71_v20 }
  0x61   :  { %v3178_v60 = vpack.c.bf16 %v3857_v59, %v3856_v29  ;;  %3861 = vst [vmem:[#allocation3_spill] sm:$0xff] %v3213_v12  ;;  %v3248_v19 = vsub.f32 %v17_v53, %v3215_v44  ;;  %v3775_v56 = vand.u32 4294901760, %v3209_v15  ;;  %v3774_v61 = vand.u32 4294901760, %v3211_v14 }
  0x62   :  { %2383 = vmatpush3.bf16.msra.mxu0 %v3056_v40  ;;  %v3218_v40 = vsub.f32 %v52_v43, %v958_v51  ;;  %v1179_v21 = vsub.f32 %v3128_v33, %v3784_v22  ;;  %v1067_v43 = vsub.f32 %v3138_v46, %v3780_v2  ;;  %v1074_v10 = vsub.f32 %v3140_v63, %v3779_v13 }
  0x63   :  { %2407 = vmatpush3.bf16.msra.mxu1 %v2695_v27  ;;  %2385 = vmatprep.subr.bf16.mxu0 %v3062_v58  ;;  %v967_v27 = vand.u32 4294901760, %v55_v34  ;;  %v72_v58 = vld [vmem:[%s3723_s1 + $0x1b0] sm:$0xff]  ;;  %v3241_v23 = vpack.c.bf16 %v1015_v52, %v1012_v6  ;;  %v3245_v47 = vsub.f32 %v71_v20, %v1015_v52  ;;  %v1021_v51 = vand.u32 4294901760, %v73_v28 }
  0x64   :  { %2409 = vmatprep.subr.bf16.mxu1 %v2712_v39  ;;  %v1186_v39 = vsub.f32 %v3136_v55, %v3781_v37  ;;  %v1018_v35 = vand.u32 4294901760, %v72_v58  ;;  %v1180_v20 = vand.u32 4294901760, %v1179_v21  ;;  %v1068_v59 = vand.u32 4294901760, %v1067_v43 }
  0x65   :  { %3863 = vst [vmem:[#allocation4_spill] sm:$0xff] %v3241_v23  ;;  %v3260_v0 = vpack.c.bf16 %v967_v27, %v964_v25  ;;  %v1075_v5 = vand.u32 4294901760, %v1074_v10  ;;  %v3772_v30 = vand.u32 4294901760, %v3218_v40  ;;  %v973_v6 = vand.u32 4294901760, %v57_v50 }
  0x66   :  { %2387 = vmatpush3.bf16.msra.mxu0 %v3068_v24  ;;  %v56_v24 = vld [vmem:[%s3723_s1 + $0x130] sm:$0xff]  ;;  %v1187_v29 = vand.u32 4294901760, %v1186_v39  ;;  %v3773_v52 = vand.u32 4294901760, %v3229_v38  ;;  %v3785_v21 = vand.u32 4294901760, %v3248_v19  ;;  %v3776_v39 = vand.u32 4294901760, %v3245_v47 }
  0x67   :  { %2411 = vmatpush3.bf16.msra.mxu1 %v2723_v45  ;;  %2389 = vmatprep.subr.bf16.mxu0 %v2388_v3  ;;  %3864 = vst [vmem:[#allocation5_spill] sm:$0xff] %v3260_v0  ;;  %v3262_v45 = vsub.f32 %v54_v41, %v964_v25  ;;  %v3264_v3 = vsub.f32 %v55_v34, %v967_v27  ;;  %v970_v53 = vand.u32 4294901760, %v56_v24 }
  0x68   :  { %2413 = vmatprep.subr.bf16.mxu1 %v2751_v62  ;;  %v74_v62 = vld [vmem:[%s3723_s1 + $0x1c0] sm:$0xff]  ;;  %v3274_v41 = vpack.c.bf16 %v1021_v51, %v1018_v35  ;;  %v1200_v34 = vsub.f32 %v3211_v14, %v3774_v61  ;;  %v3283_v25 = vsub.f32 %v72_v58, %v1018_v35  ;;  %v3285_v27 = vsub.f32 %v73_v28, %v1021_v51 }
  0x69   :  { %v3292_v43 = vpack.c.bf16 %v1187_v29, %v1180_v20  ;;  %v3294_v10 = vpack.c.bf16 %v1075_v5, %v1068_v59  ;;  %v1024_v58 = vand.u32 4294901760, %v74_v62  ;;  %v3300_v28 = vpack.c.bf16 %v973_v6, %v970_v53 }
  0x6a   :  { %2391 = vmatpush3.bf16.msra.mxu0 %v2390_v42  ;;  %3865 = vst [vmem:[#allocation6_spill] sm:$0xff] %v3274_v41  ;;  %v1193_v42 = vsub.f32 %v3209_v15, %v3775_v56  ;;  %v1088_v35 = vsub.f32 %v3229_v38, %v3773_v52  ;;  %v3777_v51 = vand.u32 4294901760, %v3262_v45  ;;  %v1050_v20 = vsub.f32 %v3248_v19, %v3785_v21  ;;  %v59_v56 = vld [vmem:[%s3723_s1 + $0x148] sm:$0xff] }
  0x6b   :  { %2415 = vmatpush3.bf16.msra.mxu1 %v2776_v16  ;;  %2393 = vmatprep.subr.bf16.mxu0 %v3159_v9  ;;  %v75_v16 = vld [vmem:[%s3723_s1 + $0x1c8] sm:$0xff]  ;;  %v3778_v9 = vand.u32 4294901760, %v3243_v17  ;;  %3866 = vst [vmem:[#allocation8_spill] sm:$0xff] %v3300_v28  ;;  %v1201_v59 = vand.u32 4294901760, %v1200_v34  ;;  %v3316_v52 = vsub.f32 %v56_v24, %v970_v53  ;;  %v3318_v61 = vsub.f32 %v57_v50, %v973_v6 }
  0x6c   :  { %2417 = vmatprep.subr.bf16.mxu1 %v2794_v49  ;;  %v1081_v49 = vsub.f32 %v3218_v40, %v3772_v30  ;;  %v1194_v29 = vand.u32 4294901760, %v1193_v42  ;;  %v1027_v5 = vand.u32 4294901760, %v75_v16  ;;  %v3782_v30 = vand.u32 4294901760, %v3264_v3 }
  0x6d   :  { %v3326_v34 = vsub.f32 %v74_v62, %v1024_v58  ;;  %v3786_v24 = vand.u32 4294901760, %v3285_v27  ;;  %v1089_v50 = vand.u32 4294901760, %v1088_v35  ;;  %v1095_v6 = vsub.f32 %v3262_v45, %v3777_v51  ;;  %v76_v62 = vld [vmem:[%s3723_s1 + $0x1d0] sm:$0xff] }
  0x6e   :  { %2395 = vmatpush3.bf16.msra.mxu0 %v3172_v7  ;;  %v58_v7 = vld [vmem:[%s3723_s1 + $0x140] sm:$0xff]  ;;  %v1082_v42 = vand.u32 4294901760, %v1081_v49  ;;  %v77_v49 = vld [vmem:[%s3723_s1 + $0x1d8] sm:$0xff]  ;;  %v3347_v35 = vpack.c.bf16 %v1027_v5, %v1024_v58  ;;  %v1102_v51 = vsub.f32 %v3264_v3, %v3782_v30  ;;  %v979_v37 = vand.u32 4294901760, %v59_v56 }
  0x6f   :  { %2419 = vmatpush3.bf16.msra.mxu1 %v2818_v4  ;;  %2397 = vmatprep.subr.bf16.mxu0 %v3178_v60  ;;  %v1207_v4 = vsub.f32 %v3243_v17, %v3778_v9  ;;  %v1214_v60 = vsub.f32 %v3245_v47, %v3776_v39  ;;  %v976_v53 = vand.u32 4294901760, %v58_v7  ;;  %v1051_v39 = vand.u32 4294901760, %v1050_v20  ;;  %v61_v58 = vld [vmem:[%s3723_s1 + $0x158] sm:$0xff] }
  0x70   :  { %2421 = vmatprep.subr.bf16.mxu1 %v2836_v48  ;;  %v3783_v48 = vand.u32 4294901760, %v3283_v25  ;;  %3867 = vst [vmem:[#allocation9_spill] sm:$0xff] %v3347_v35  ;;  %v3353_v9 = vsub.f32 %v75_v16, %v1027_v5  ;;  %v1030_v20 = vand.u32 4294901760, %v76_v62  ;;  %v1228_v16 = vsub.f32 %v3285_v27, %v3786_v24 }
  0x71   :  { %v1208_v13 = vand.u32 4294901760, %v1207_v4  ;;  %v1215_v2 = vand.u32 4294901760, %v1214_v60  ;;  %v3371_v5 = vsub.f32 %v58_v7, %v976_v53  ;;  %v1096_v4 = vand.u32 4294901760, %v1095_v6 }
  0x72   :  { %2399 = vmatpush3.bf16.msra.mxu0 %v3184_v8  ;;  %v3345_v8 = vpack.c.bf16 %v1201_v59, %v1194_v29  ;;  %v1033_v29 = vand.u32 4294901760, %v77_v49  ;;  %v3369_v59 = vpack.c.bf16 %v1089_v50, %v1082_v42  ;;  %v1103_v30 = vand.u32 4294901760, %v1102_v51  ;;  %v78_v42 = vld [vmem:[%s3723_s1 + $0x1e0] sm:$0xff] }
  0x73   :  { %2423 = vmatpush3.bf16.msra.mxu1 %v3842_v18  ;;  %2433 = vmatprep.subr.bf16.mxu0 %v3191_v54  ;;  %v60_v18 = vld [vmem:[%s3723_s1 + $0x150] sm:$0xff]  ;;  %v985_v22 = vand.u32 4294901760, %v61_v58  ;;  %v3381_v7 = vpack.c.bf16 %v1215_v2, %v1208_v13  ;;  %v3383_v50 = vpack.c.bf16 %v979_v37, %v976_v53  ;;  %v3787_v51 = vand.u32 4294901760, %v3326_v34 }
  0x74   :  { %2425 = vmatprep.subr.bf16.mxu1 %v3843_v11  ;;  %v1221_v11 = vsub.f32 %v3283_v25, %v3783_v48  ;;  %v982_v48 = vand.u32 4294901760, %v60_v18  ;;  %v3391_v6 = vpack.c.bf16 %v1033_v29, %v1030_v20  ;;  %v1229_v21 = vand.u32 4294901760, %v1228_v16 }
  0x75   :  { %842 = vmatmul.mubr.f32.vlgmr.msra.gmra.mrb[4].mxu0 %v2958_v57  ;;  %v3402_v2 = vsub.f32 %v77_v49, %v1033_v29  ;;  %v3872_v13 = vand.u32 4294901760, %v3316_v52  ;;  %v1036_v53 = vand.u32 4294901760, %v78_v42  ;;  %v3873_v60 = vand.u32 4294901760, %v3318_v61 }
  0x76   :  { %2435 = vmatpush3.bf16.msra.mxu0 %v3203_v1  ;;  %1052 = vmatprep.mubr.f32.mxu0 %v1051_v39  ;;  %v3385_v39 = vsub.f32 %v59_v56, %v979_v37  ;;  %3869 = vst [vmem:[#allocation11_spill] sm:$0xff] %v3391_v6  ;;  %v1222_v24 = vand.u32 4294901760, %v1221_v11  ;;  %v3400_v37 = vsub.f32 %v76_v62, %v1030_v20 }
  0x77   :  { %2427 = vmatpush3.bf16.msra.mxu1 %v3845_v31  ;;  %2437 = vmatprep.subr.bf16.mxu0 %v3205_v36  ;;  %v79_v31 = vld [vmem:[%s3723_s1 + $0x1e8] sm:$0xff]  ;;  %3871 = vst [vmem:[#allocation13_spill] sm:$0xff] %v3402_v2  ;;  %v1109_v56 = vsub.f32 %v3316_v52, %v3872_v13  ;;  %v3409_v11 = vpack.c.bf16 %v1103_v30, %v1096_v4  ;;  %v3879_v36 = vand.u32 4294901760, %v3402_v2 }
  0x78   :  { %2429 = vmatprep.subr.bf16.mxu1 %v3846_v32  ;;  %3868 = vst [vmem:[#allocation10_spill] sm:$0xff] %v3385_v39  ;;  %v3397_v32 = vld [vmem:[%s3723_s1 + $0x160] sm:$0xff]  ;;  %3870 = vst [vmem:[#allocation12_spill] sm:$0xff] %v3400_v37  ;;  %v3411_v16 = vpack.c.bf16 %v985_v22, %v982_v48  ;;  %v1116_v62 = vsub.f32 %v3318_v61, %v3873_v60  ;;  %v1039_v20 = vand.u32 4294901760, %v79_v31  ;;  %v3427_v30 = vld [vmem:[%s3723_s1 + $0x168] sm:$0xff]  ;;  %v3874_v60 = vand.u32 4294901760, %v3353_v9 }
  0x79   :  { %v3417_v49 = vsub.f32 %v60_v18, %v982_v48  ;;  %v3419_v29 = vsub.f32 %v61_v58, %v985_v22  ;;  %v2476_v13 = vpack.c.bf16 %v1229_v21, %v1222_v24  ;;  %v3438_v18 = vld [vmem:[%s3723_s1 + $0x1f0] sm:$0xff]  ;;  %v3443_v58 = vld [vmem:[%s3723_s1 + $0x1f8] sm:$0xff]  ;;  %v1110_v21 = vand.u32 4294901760, %v1109_v56 }
  0x7a   :  { %2439 = vmatpush3.bf16.msra.mxu0 %v3213_v12  ;;  %v3447_v24 = vsub.f32 %v78_v42, %v1036_v53  ;;  %v16_v22 = vld [vmem:[%s3724_s0 + $0x10] sm:$0xff]  ;;  %v1117_v48 = vand.u32 4294901760, %v1116_v62  ;;  %v3456_v4 = vpack.c.bf16 %v1039_v20, %v1036_v53  ;;  %v991_v42 = vand.u32 4294901760, %v3427_v30 }
  0x7b   :  { %2431 = vmatpush3.bf16.msra.mxu1 %v3847_v26  ;;  %2441 = vmatprep.subr.bf16.mxu0 %v3241_v23  ;;  %v1235_v26 = vsub.f32 %v3326_v34, %v3787_v51  ;;  %v3875_v51 = vand.u32 4294901760, %v3397_v32  ;;  %v3472_v53 = vld [vmem:[%s3723_s1 + $0x170] sm:$0xff]  ;;  %v3878_v23 = vand.u32 4294901760, %v3400_v37 }
  0x7c   :  { %2465 = vmatprep.subr.bf16.mxu1 %v3292_v43  ;;  %v1242_v43 = vsub.f32 %v3353_v9, %v3874_v60 }
  0x7d   :  { %v1236_v56 = vand.u32 4294901760, %v1235_v26  ;;  %v3465_v60 = vsub.f32 %v3397_v32, %v3875_v51  ;;  %v3876_v51 = vand.u32 4294901760, %v3371_v5  ;;  %v1249_v12 = vsub.f32 %v3400_v37, %v3878_v23 }
  0x7e   :  { %946 = vmatmul.mubr.f32.vlgmr.msra.gmra.mrb[4].mxu1 %v2958_v57  ;;  %2443 = vmatpush3.bf16.msra.mxu0 %v3260_v0  ;;  %v3458_v57 = vsub.f32 %v79_v31, %v1039_v20  ;;  %v1042_v0 = vand.u32 4294901760, %v3438_v18  ;;  %v3477_v31 = vld [vmem:[%s3723_s1 + $0x178] sm:$0xff]  ;;  %v3877_v20 = vand.u32 4294901760, %v3385_v39 }
  0x7f   :  { %2467 = vmatpush3.bf16.msra.mxu1 %v3294_v10  ;;  %2445 = vmatprep.subr.bf16.mxu0 %v3274_v41  ;;  %v1045_v10 = vand.u32 4294901760, %v3443_v58  ;;  %v1123_v62 = vsub.f32 %v3371_v5, %v3876_v51  ;;  %v3486_v41 = vand.u32 4294901760, %v16_v22  ;;  %v997_v23 = vand.u32 4294901760, %v3477_v31 }
  0x80   :  { %2469 = vmatprep.subr.bf16.mxu1 %v3345_v8  ;;  %1288 = vmatprep.mubr.f32.mxu1 %v3215_v44  ;;  %v1243_v8 = vand.u32 4294901760, %v1242_v43  ;;  %v1130_v26 = vsub.f32 %v3385_v39, %v3877_v20  ;;  %v1256_v43 = vsub.f32 %v3402_v2, %v3879_v36  ;;  %v2478_v20 = vpack.c.bf16 %v1117_v48, %v1110_v21 }
  0x81   :  { %v3500_v39 = vsub.f32 %v3427_v30, %v991_v42  ;;  %v3506_v36 = vsub.f32 %v3438_v18, %v1042_v0  ;;  %v3509_v44 = vsub.f32 %v3443_v58, %v1045_v10  ;;  %v3812_v51 = vand.u32 4294901760, %v3458_v57 }
  0x82   :  { %2447 = vmatpush3.bf16.msra.mxu0 %v3300_v28  ;;  %v994_v28 = vand.u32 4294901760, %v3472_v53  ;;  %v2480_v48 = vpack.c.bf16 %v1243_v8, %v1236_v56  ;;  %v1124_v21 = vand.u32 4294901760, %v1123_v62  ;;  %v1131_v30 = vand.u32 4294901760, %v1130_v26 }
  0x83   :  { %2471 = vmatpush3.bf16.msra.mxu1 %v3369_v59  ;;  %2449 = vmatprep.subr.bf16.mxu0 %v3347_v35  ;;  %v3514_v35 = vsub.f32 %v16_v22, %v3486_v41  ;;  %v1250_v2 = vand.u32 4294901760, %v1249_v12  ;;  %v3880_v18 = vand.u32 4294901760, %v3417_v49  ;;  %v3881_v58 = vand.u32 4294901760, %v3419_v29 }
  0x84   :  { %2473 = vmatprep.subr.bf16.mxu1 %v3381_v7  ;;  %v1257_v7 = vand.u32 4294901760, %v1256_v43  ;;  %v3526_v56 = vsub.f32 %v3472_v53, %v994_v28  ;;  %v3529_v22 = vsub.f32 %v3477_v31, %v997_v23  ;;  %v3882_v62 = vand.u32 4294901760, %v3447_v24 }
  0x85   :  { %v1137_v37 = vsub.f32 %v3417_v49, %v3880_v18  ;;  %v1144_v59 = vsub.f32 %v3419_v29, %v3881_v58  ;;  %v1276_v43 = vand.u32 4294901760, %v3506_v36  ;;  %v3883_v31 = vand.u32 4294901760, %v3397_v32 }
  0x86   :  { %2451 = vmatpush3.bf16.msra.mxu0 %v3383_v50  ;;  %v1263_v26 = vsub.f32 %v3447_v24, %v3882_v62  ;;  %v3545_v58 = vpack.c.bf16 %v1045_v10, %v1042_v0  ;;  %v2482_v8 = vpack.c.bf16 %v1131_v30, %v1124_v21  ;;  %v2484_v62 = vpack.c.bf16 %v1257_v7, %v1250_v2 }
  0x87   :  { %2475 = vmatpush3.bf16.msra.mxu1 %v3409_v11  ;;  %2453 = vmatprep.subr.bf16.mxu0 %v3391_v6  ;;  %v1270_v11 = vsub.f32 %v3458_v57, %v3812_v51  ;;  %v3543_v18 = vpack.c.bf16 %v991_v42, %v3883_v31  ;;  %v1138_v12 = vand.u32 4294901760, %v1137_v37  ;;  %v1145_v6 = vand.u32 4294901760, %v1144_v59 }
  0x88   :  { %2477 = vmatprep.subr.bf16.mxu1 %v2476_v13  ;;  %v1055_v13 = vand.u32 4294901760, %v3514_v35  ;;  %v3884_v51 = vand.u32 4294901760, %v3465_v60  ;;  %v3885_v32 = vand.u32 4294901760, %v3500_v39  ;;  %v3813_v42 = vand.u32 4294901760, %v3526_v56 }
  0x89   :  { %v3814_v10 = vand.u32 4294901760, %v3529_v22  ;;  %v1264_v21 = vand.u32 4294901760, %v1263_v26  ;;  %v1271_v2 = vand.u32 4294901760, %v1270_v11  ;;  %v1277_v37 = vsub.f32 %v3506_v36, %v1276_v43 }
  0x8a   :  { %2455 = vmatpush3.bf16.msra.mxu0 %v3411_v16  ;;  %v1151_v53 = vsub.f32 %v3465_v60, %v3884_v51  ;;  %v1158_v0 = vsub.f32 %v3500_v39, %v3885_v32  ;;  %v1056_v51 = vsub.f32 %v3514_v35, %v1055_v13  ;;  %v3568_v30 = vpack.c.bf16 %v997_v23, %v994_v28 }
  0x8b   :  { %2479 = vmatpush3.bf16.msra.mxu1 %v2478_v20  ;;  %2457 = vmatprep.subr.bf16.mxu0 %v3456_v4  ;;  %v3886_v20 = vand.u32 4294901760, %v3509_v44  ;;  %v2486_v7 = vpack.c.bf16 %v1145_v6, %v1138_v12  ;;  %v1165_v31 = vsub.f32 %v3526_v56, %v3813_v42  ;;  %v1172_v32 = vsub.f32 %v3529_v22, %v3814_v10 }
  0x8c   :  { %2481 = vmatprep.subr.bf16.mxu1 %v2480_v48  ;;  %v2496_v48 = vpack.c.bf16 %v3136_v55, %v3128_v33  ;;  %v1152_v26 = vand.u32 4294901760, %v1151_v53  ;;  %v1159_v11 = vand.u32 4294901760, %v1158_v0  ;;  %v2488_v28 = vpack.c.bf16 %v1271_v2, %v1264_v21 }
  0x8d   :  { %v1284_v59 = vsub.f32 %v3509_v44, %v3886_v20  ;;  %v1278_v23 = vand.u32 4294901760, %v1277_v37  ;;  %v1057_v12 = vand.u32 4294901760, %v1056_v51  ;;  %v2500_v0 = vpack.c.bf16 %v3211_v14, %v3209_v15  ;;  %v3887_v51 = vld [vmem:[#allocation2_spill] sm:$0xff] }
  0x8e   :  { %2459 = vmatpush3.bf16.msra.mxu0 %v3543_v18  ;;  %v2490_v53 = vpack.c.bf16 %v1159_v11, %v1152_v26  ;;  %v1166_v20 = vand.u32 4294901760, %v1165_v31  ;;  %v1173_v42 = vand.u32 4294901760, %v1172_v32  ;;  %v2504_v2 = vpack.c.bf16 %v3245_v47, %v3243_v17  ;;  %v3890_v11 = vld [vmem:[#allocation3_spill] sm:$0xff]  ;;  %v3891_v31 = vld [vmem:[#allocation12_spill] sm:$0xff]  ;;  %v3892_v32 = vld [vmem:[#allocation13_spill] sm:$0xff] }
  0x8f   :  { %2483 = vmatpush3.bf16.msra.mxu1 %v2482_v8  ;;  %2461 = vmatprep.subr.bf16.mxu0 %v3545_v58  ;;  %v1285_v6 = vand.u32 4294901760, %v1284_v59  ;;  %v2498_v8 = vpack.c.bf16 %v3140_v63, %v3138_v46  ;;  %v2506_v37 = vpack.c.bf16 %v3264_v3, %v3262_v45  ;;  %v2508_v59 = vpack.c.bf16 %v3285_v27, %v3283_v25 }
  0x90   :  { %2485 = vmatprep.subr.bf16.mxu1 %v2484_v62  ;;  %v2502_v62 = vpack.c.bf16 %v3229_v38, %v3218_v40  ;;  %v2494_v21 = vpack.c.bf16 %v1173_v42, %v1166_v20  ;;  %v2510_v42 = vpack.c.bf16 %v3318_v61, %v3316_v52  ;;  %v2524_v20 = vpack.c.bf16 %v3509_v44, %v3506_v36 }
  0x91   :  { %v2492_v10 = vpack.c.bf16 %v1285_v6, %v1278_v23  ;;  %v3893_v23 = vld [vmem:[#allocation4_spill] sm:$0xff]  ;;  %v2518_v6 = vpack.c.bf16 %v3419_v29, %v3417_v49 }
  0x92   :  { %2463 = vmatpush3.bf16.msra.mxu0 %v3568_v30 }
  0x93   :  { %2487 = vmatpush3.bf16.msra.mxu1 %v2486_v7  ;;  %2497 = vmatprep.subr.bf16.mxu0 %v2496_v48  ;;  %v3888_v7 = vand.u32 4294901760, %v3248_v19  ;;  %v3889_v48 = vld [vmem:[#allocation10_spill] sm:$0xff] }
  0x94   :  { %2489 = vmatprep.subr.bf16.mxu1 %v2488_v28  ;;  %v2514_v26 = vpack.c.bf16 %v3889_v48, %v3371_v5  ;;  %v2516_v28 = vpack.c.bf16 %v3892_v32, %v3891_v31 }
  0x95   :  { %1058 = vmatmul.mubr.f32.vlgmr.msra.gmra.mrb[6].mxu0 %v1057_v12  ;;  %v3894_v12 = vld [vmem:[#allocation5_spill] sm:$0xff] }
  0x96   :  { %2499 = vmatpush3.bf16.msra.mxu0 %v2498_v8  ;;  %1425 = vmatprep.mubr.f32.mxu0 %v3248_v19  ;;  %v2520_v19 = vpack.c.bf16 %v3458_v57, %v3447_v24  ;;  %v3895_v8 = vld [vmem:[#allocation6_spill] sm:$0xff] }
  0x97   :  { %2491 = vmatpush3.bf16.msra.mxu1 %v2490_v53  ;;  %2501 = vmatprep.subr.bf16.mxu0 %v2500_v0  ;;  %v2522_v53 = vpack.c.bf16 %v3500_v39, %v3465_v60  ;;  %v3896_v0 = vld [vmem:[#allocation8_spill] sm:$0xff] }
  0x98   :  { %2493 = vmatprep.subr.bf16.mxu1 %v2492_v10  ;;  %v2512_v10 = vpack.c.bf16 %v3353_v9, %v3326_v34 }
  0x9a   :  { %2503 = vmatpush3.bf16.msra.mxu0 %v2502_v62  ;;  %v3897_v62 = vld [vmem:[#allocation9_spill] sm:$0xff] }
  0x9b   :  { %2495 = vmatpush3.bf16.msra.mxu1 %v2494_v21  ;;  %2505 = vmatprep.subr.bf16.mxu0 %v2504_v2  ;;  %v2526_v21 = vpack.c.bf16 %v3529_v22, %v3526_v56  ;;  %v3898_v2 = vand.u32 4294901760, %v3128_v33  ;;  %v3905_v33 = vand.u32 4294901760, %v3218_v40  ;;  %v3911_v40 = vand.u32 4294901760, %v3264_v3 }
  0x9c   :  { %2529 = vmatprep.subr.bf16.mxu1 %v3191_v54  ;;  %v3916_v3 = vand.u32 4294901760, %v3326_v34 }
  0x9e   :  { %1290 = vmatmul.mubr.f32.vlgmr.msra.gmra.mrb[6].mxu1 %v3486_v41  ;;  %2507 = vmatpush3.bf16.msra.mxu0 %v2506_v37  ;;  %v3899_v37 = vand.u32 4294901760, %v3136_v55  ;;  %v3906_v55 = vand.u32 4294901760, %v3229_v38  ;;  %v3912_v38 = vand.u32 4294901760, %v3283_v25  ;;  %v3917_v25 = vand.u32 4294901760, %v3353_v9 }
  0x9f   :  { %2531 = vmatpush3.bf16.msra.mxu1 %v3203_v1  ;;  %2509 = vmatprep.subr.bf16.mxu0 %v2508_v59  ;;  %v3922_v9 = vand.u32 4294901760, %v3417_v49  ;;  %v3928_v49 = vand.u32 4294901760, %v3509_v44 }
  0xa0   :  { %2533 = vmatprep.subr.bf16.mxu1 %v3887_v51  ;;  %1532 = vmatprep.mubr.f32.mxu1 %v3888_v7  ;;  %v2560_v59 = vpack.c.bf16 %v3899_v37, %v3898_v2  ;;  %v3902_v7 = vand.u32 4294901760, %v3140_v63  ;;  %v3907_v63 = vld [vmem:[#allocation7_spill] sm:$0xff]  ;;  %v3913_v2 = vand.u32 4294901760, %v3285_v27  ;;  %v2576_v27 = vpack.c.bf16 %v3917_v25, %v3916_v3 }
  0xa2   :  { %2511 = vmatpush3.bf16.msra.mxu0 %v2510_v42  ;;  %v3900_v42 = vld [vmem:[#allocation11_spill] sm:$0xff]  ;;  %v2572_v37 = vpack.c.bf16 %v3913_v2, %v3912_v38 }
  0xa3   :  { %2535 = vmatpush3.bf16.msra.mxu1 %v3890_v11  ;;  %2513 = vmatprep.subr.bf16.mxu0 %v2512_v10  ;;  %v3901_v10 = vand.u32 4294901760, %v3138_v46  ;;  %v2566_v46 = vpack.c.bf16 %v3906_v55, %v3905_v33 }
  0xa4   :  { %2537 = vmatprep.subr.bf16.mxu1 %v3893_v23 }
  0xa6   :  { %2515 = vmatpush3.bf16.msra.mxu0 %v2514_v26  ;;  %v2562_v26 = vpack.c.bf16 %v3902_v7, %v3901_v10 }
  0xa7   :  { %2539 = vmatpush3.bf16.msra.mxu1 %v3894_v12  ;;  %2517 = vmatprep.subr.bf16.mxu0 %v2516_v28  ;;  %v3903_v28 = vand.u32 4294901760, %v3209_v15  ;;  %v3908_v15 = vand.u32 4294901760, %v3243_v17  ;;  %v3914_v17 = vand.u32 4294901760, %v3316_v52  ;;  %v3919_v52 = vand.u32 4294901760, %v3889_v48 }
  0xa8   :  { %2541 = vmatprep.subr.bf16.mxu1 %v3895_v8  ;;  %v3925_v48 = vand.u32 4294901760, %v3458_v57  ;;  %v3930_v57 = vand.u32 4294901760, %v3529_v22 }
  0xaa   :  { %2519 = vmatpush3.bf16.msra.mxu0 %v2518_v6  ;;  %v3904_v6 = vand.u32 4294901760, %v3211_v14  ;;  %v3909_v14 = vand.u32 4294901760, %v3245_v47  ;;  %v3915_v47 = vand.u32 4294901760, %v3318_v61  ;;  %v3921_v61 = vand.u32 4294901760, %v3892_v32 }
  0xab   :  { %2543 = vmatpush3.bf16.msra.mxu1 %v3896_v0  ;;  %2521 = vmatprep.subr.bf16.mxu0 %v2520_v19  ;;  %v3927_v32 = vand.u32 4294901760, %v3500_v39 }
  0xac   :  { %2545 = vmatprep.subr.bf16.mxu1 %v3897_v62  ;;  %v2564_v19 = vpack.c.bf16 %v3904_v6, %v3903_v28 }
  0xae   :  { %2523 = vmatpush3.bf16.msra.mxu0 %v2522_v53  ;;  %v2568_v53 = vpack.c.bf16 %v3909_v14, %v3908_v15 }
  0xaf   :  { %2547 = vmatpush3.bf16.msra.mxu1 %v3383_v50  ;;  %2525 = vmatprep.subr.bf16.mxu0 %v2524_v20  ;;  %v3910_v20 = vand.u32 4294901760, %v3262_v45  ;;  %v2574_v45 = vpack.c.bf16 %v3915_v47, %v3914_v17 }
  0xb0   :  { %2549 = vmatprep.subr.bf16.mxu1 %v3900_v42 }
  0xb2   :  { %2527 = vmatpush3.bf16.msra.mxu0 %v2526_v21  ;;  %v2570_v21 = vpack.c.bf16 %v3911_v40, %v3910_v20 }
  0xb3   :  { %2551 = vmatpush3.bf16.msra.mxu1 %v3411_v16  ;;  %2561 = vmatprep.subr.bf16.mxu0 %v2560_v59 }
  0xb4   :  { %2553 = vmatprep.subr.bf16.mxu1 %v3456_v4 }
  0xb5   :  { %1428 = vmatmul.mubr.f32.vlgmr.msra.gmra.mrb[8].mxu0 %v3514_v35 }
  0xb6   :  { %2563 = vmatpush3.bf16.msra.mxu0 %v2562_v26  ;;  %1702 = vmatprep.mubr.f32.mxu0 %v3907_v63 }
  0xb7   :  { %2555 = vmatpush3.bf16.msra.mxu1 %v3543_v18  ;;  %2565 = vmatprep.subr.bf16.mxu0 %v2564_v19 }
  0xb8   :  { %2557 = vmatprep.subr.bf16.mxu1 %v3545_v58 }
  0xba   :  { %2567 = vmatpush3.bf16.msra.mxu0 %v2566_v46 }
  0xbb   :  { %2559 = vmatpush3.bf16.msra.mxu1 %v3568_v30  ;;  %2569 = vmatprep.subr.bf16.mxu0 %v2568_v53 }
  0xbc   :  { %2593 = vmatprep.subr.bf16.mxu1 %v3191_v54  ;;  %v3918_v54 = vand.u32 4294901760, %v3371_v5  ;;  %v3924_v5 = vand.u32 4294901760, %v3447_v24  ;;  %v3929_v24 = vand.u32 4294901760, %v3526_v56 }
  0xbe   :  { %1536 = vmatmul.mubr.f32.vlgmr.msra.gmra.mrb[8].mxu1 %v1055_v13  ;;  %2571 = vmatpush3.bf16.msra.mxu0 %v2570_v21  ;;  %v2578_v35 = vpack.c.bf16 %v3919_v52, %v3918_v54  ;;  %v3923_v13 = vand.u32 4294901760, %v3419_v29  ;;  %v2588_v29 = vpack.c.bf16 %v3928_v49, %v1276_v43 }
  0xbf   :  { %2595 = vmatpush3.bf16.msra.mxu1 %v3203_v1  ;;  %2573 = vmatprep.subr.bf16.mxu0 %v2572_v37  ;;  %v3920_v1 = vand.u32 4294901760, %v3891_v31  ;;  %v3926_v31 = vand.u32 4294901760, %v3465_v60  ;;  %v1819_v60 = vld [vmem:[%s3725_s2] ss:$0 sm:$0xff] }
  0xc0   :  { %2597 = vmatprep.subr.bf16.mxu1 %v3887_v51  ;;  %1806 = vmatprep.mubr.f32.mxu1 %v3907_v63  ;;  %v2582_v51 = vpack.c.bf16 %v3923_v13, %v3922_v9 }
  0xc1   :  { %v2580_v34 = vpack.c.bf16 %v3921_v61, %v3920_v1 }
  0xc2   :  { %2575 = vmatpush3.bf16.msra.mxu0 %v2574_v45 }
  0xc3   :  { %2599 = vmatpush3.bf16.msra.mxu1 %v3890_v11  ;;  %2577 = vmatprep.subr.bf16.mxu0 %v2576_v27  ;;  %v2584_v11 = vpack.c.bf16 %v3925_v48, %v3924_v5 }
  0xc4   :  { %2601 = vmatprep.subr.bf16.mxu1 %v3893_v23  ;;  %v2586_v23 = vpack.c.bf16 %v3927_v32, %v3926_v31 }
  0xc6   :  { %2579 = vmatpush3.bf16.msra.mxu0 %v2578_v35 }
  0xc7   :  { %2603 = vmatpush3.bf16.msra.mxu1 %v3894_v12  ;;  %2581 = vmatprep.subr.bf16.mxu0 %v2580_v34  ;;  %v2590_v12 = vpack.c.bf16 %v3930_v57, %v3929_v24 }
  0xc8   :  { %2605 = vmatprep.subr.bf16.mxu1 %v3895_v8 }
  0xca   :  { %2583 = vmatpush3.bf16.msra.mxu0 %v2582_v51 }
  0xcb   :  { %2607 = vmatpush3.bf16.msra.mxu1 %v3896_v0  ;;  %2585 = vmatprep.subr.bf16.mxu0 %v2584_v11 }
  0xcc   :  { %2609 = vmatprep.subr.bf16.mxu1 %v3897_v62 }
  0xce   :  { %2587 = vmatpush3.bf16.msra.mxu0 %v2586_v23 }
  0xcf   :  { %2611 = vmatpush3.bf16.msra.mxu1 %v3383_v50  ;;  %2589 = vmatprep.subr.bf16.mxu0 %v2588_v29 }
  0xd0   :  { %2613 = vmatprep.subr.bf16.mxu1 %v3900_v42 }
  0xd2   :  { %2591 = vmatpush3.bf16.msra.mxu0 %v2590_v12 }
  0xd3   :  { %2615 = vmatpush3.bf16.msra.mxu1 %v3411_v16 }
  0xd4   :  { %2617 = vmatprep.subr.bf16.mxu1 %v3456_v4 }
  0xd5   :  { %1704 = vmatmul.mubr.f32.vlgmr.msra.gmra.mrb[10].mxu0 %v3486_v41 }
  0xd7   :  { %2619 = vmatpush3.bf16.msra.mxu1 %v3543_v18 }
  0xd8   :  { %2621 = vmatprep.subr.bf16.mxu1 %v3545_v58 }
  0xdb   :  { %2623 = vmatpush3.bf16.msra.mxu1 %v3568_v30 }
  0xde   :  { %1808 = vmatmul.mubr.f32.vlgmr.msra.gmra.mrb[10].mxu1 %v3486_v41 }
 0x108   :  { %v1852_v44 = vpop.f32.mrb[0].mxu0 }
 0x109   :  { %v1853_v50 = vpop.f32.mrb[1].mxu0 }
 0x10a   :  { %v1854_v39 = vadd.f32 %v1853_v50, %v1852_v44 }
 0x10c   :  { %v198_v16 = vadd.f32 %v1854_v39, %v1819_v60 }
 0x111   :  { %v1887_v36 = vpop.f32.mrb[0].mxu1 }
 0x112   :  { %v1888_v4 = vpop.f32.mrb[1].mxu1 }
 0x113   :  { %v1889_v56 = vadd.f32 %v1888_v4, %v1887_v36 }
 0x115   :  { %v430_v22 = vadd.f32 %v1889_v56, %v198_v16 }
 0x128   :  { %v1922_v43 = vpop.f32.mrb[2].mxu0 }
 0x129   :  { %v1923_v18 = vpop.f32.mrb[3].mxu0 }
 0x12a   :  { %v1924_v8 = vadd.f32 %v1923_v18, %v1922_v43 }
 0x12c   :  { %v568_v58 = vadd.f32 %v1924_v8, %v430_v22 }
 0x131   :  { %v1957_v0 = vpop.f32.mrb[2].mxu1 }
 0x132   :  { %v1958_v30 = vpop.f32.mrb[3].mxu1 }
 0x133   :  { %v1959_v62 = vadd.f32 %v1958_v30, %v1957_v0 }
 0x135   :  { %v676_v41 = vadd.f32 %v1959_v62, %v568_v58 }
 0x148   :  { %v1992_v59 = vpop.f32.mrb[4].mxu0 }
 0x149   :  { %v1993_v42 = vpop.f32.mrb[5].mxu0 }
 0x14a   :  { %v1994_v10 = vadd.f32 %v1993_v42, %v1992_v59 }
 0x14c   :  { %v844_v7 = vadd.f32 %v1994_v10, %v676_v41 }
 0x151   :  { %v2027_v26 = vpop.f32.mrb[4].mxu1 }
 0x152   :  { %v2028_v28 = vpop.f32.mrb[5].mxu1 }
 0x153   :  { %v2029_v6 = vadd.f32 %v2028_v28, %v2027_v26 }
 0x155   :  { %v948_v19 = vadd.f32 %v2029_v6, %v844_v7 }
 0x168   :  { %v2062_v33 = vpop.f32.mrb[6].mxu0 }
 0x169   :  { %v2063_v55 = vpop.f32.mrb[7].mxu0 }
 0x16a   :  { %v2064_v46 = vadd.f32 %v2063_v55, %v2062_v33 }
 0x16c   :  { %v1060_v63 = vadd.f32 %v2064_v46, %v948_v19 }
 0x171   :  { %v2097_v15 = vpop.f32.mrb[6].mxu1 }
 0x172   :  { %v2098_v14 = vpop.f32.mrb[7].mxu1 }
 0x173   :  { %v2099_v53 = vadd.f32 %v2098_v14, %v2097_v15 }
 0x175   :  { %v1292_v20 = vadd.f32 %v2099_v53, %v1060_v63 }
 0x188   :  { %v2132_v40 = vpop.f32.mrb[8].mxu0 }
 0x189   :  { %v2133_v21 = vpop.f32.mrb[9].mxu0 }
 0x18a   :  { %v2134_v38 = vadd.f32 %v2133_v21, %v2132_v40 }
 0x18c   :  { %v1430_v2 = vadd.f32 %v2134_v38, %v1292_v20 }
 0x191   :  { %v2167_v37 = vpop.f32.mrb[8].mxu1 }
 0x192   :  { %v2168_v17 = vpop.f32.mrb[9].mxu1 }
 0x193   :  { %v2169_v47 = vadd.f32 %v2168_v17, %v2167_v37 }
 0x195   :  { %v1538_v45 = vadd.f32 %v2169_v47, %v1430_v2 }
 0x1a8   :  { %v2202_v3 = vpop.f32.mrb[10].mxu0 }
 0x1a9   :  { %v2203_v25 = vpop.f32.mrb[11].mxu0 }
 0x1aa   :  { %v2204_v27 = vadd.f32 %v2203_v25, %v2202_v3 }
 0x1ac   :  { %v1706_v54 = vadd.f32 %v2204_v27, %v1538_v45 }
 0x1b1   :  { %v2237_v52 = vpop.f32.mrb[10].mxu1 }
 0x1b2   :  { %v2238_v35 = vpop.f32.mrb[11].mxu1 }
 0x1b3   :  { %v2239_v1 = vadd.f32 %v2238_v35, %v2237_v52 }
 0x1b5   :  { %v1810_v61 = vadd.f32 %v2239_v1, %v1706_v54 }
 0x1b7   :  { %1814 = vst.msk [vmem:[%s3726_s3] sm:$0xff] %vm1813_vm0, %v1810_v61 }

</bundles_post_ra>
